<compile_context>
chip_gen: v6e
topology: v6e:2x2x1
jax: 0.10.0
libtpu: 0.0.40
codegen_flags: <defaults>
</compile_context>

<pallas_src>
import jax
import jax.numpy as jnp
from jax.experimental import pallas as pl
from jax.experimental.pallas import tpu as pltpu


HIDDEN_SIZE = 128     # lane-dense small stand-in for the module's hidden_size=256
OUTPUT_SIZE = 40      # vocabulary / output size
OUT_PAD = 128         # logits padded to one full 128-lane vreg
SEQ_LEN = 8           # decode steps folded into one pallas_call


def _decoder_kernel(tok_ref, emb_ref, wg_ref, bias_ref, wout_ref, h0_ref,
                    logp_ref, hout_ref):
    """One GRU decoder step per grid iteration (time axis).

    Weights (wg/bias/wout) and h0 have constant block indices -> resident in
    VMEM across all steps. The hidden state is carried in hout_ref (constant
    output block index -> accumulator). emb_ref is the token's embedding row,
    gathered by the BlockSpec using the scalar-prefetched token ids.
    """
    del tok_ref  # only consumed by the index_maps (embedding row gather)
    H = h0_ref.shape[-1]
    t = pl.program_id(0)

    @pl.when(t == 0)
    def _init():
        hout_ref[...] = h0_ref[...]

    # output = F.relu(embedding(input))
    x = jnp.maximum(emb_ref[0], 0).astype(jnp.bfloat16)          # (1, H) bf16
    h = hout_ref[...]                                            # (1, H) f32

    # Fused gate matmuls (bf16 operands, f32 accumulation on the MXU).
    # Columns of the (1, 3H) results are [r | z | n] at 128-lane boundaries.
    gi = jnp.dot(x, wg_ref[0], preferred_element_type=jnp.float32)
    gh = jnp.dot(h.astype(jnp.bfloat16), wg_ref[1],
                 preferred_element_type=jnp.float32)

    b = bias_ref[...]                                            # (1, 4H + OUT_PAD) f32
    b_r, b_z = b[:, 0:H], b[:, H:2 * H]                          # b_ir+b_hr, b_iz+b_hz
    b_in, b_hn = b[:, 2 * H:3 * H], b[:, 3 * H:4 * H]
    b_out = b[:, 4 * H:]                                         # padded lanes = -1e30

    # GRU cell (PyTorch nn.GRU semantics), all elementwise math in f32.
    r = jax.nn.sigmoid(gi[:, 0:H] + gh[:, 0:H] + b_r)
    z = jax.nn.sigmoid(gi[:, H:2 * H] + gh[:, H:2 * H] + b_z)
    n = jnp.tanh(gi[:, 2 * H:] + b_in + r * (gh[:, 2 * H:] + b_hn))
    h_new = (1.0 - z) * n + z * h                                # (1, H) f32

    # Linear out + LogSoftmax(dim=1); padded logit lanes carry -1e30 bias.
    logits = jnp.dot(h_new.astype(jnp.bfloat16), wout_ref[...],
                     preferred_element_type=jnp.float32) + b_out  # (1, OUT_PAD)
    m = jnp.max(logits, axis=-1, keepdims=True)
    shifted = logits - m
    lse = jnp.log(jnp.sum(jnp.exp(shifted), axis=-1, keepdims=True))

    logp_ref[0] = shifted - lse
    hout_ref[...] = h_new


def decoder_rnn_forward(token_ids, hidden, params, output_size=OUTPUT_SIZE):
    """Runs T decoder steps (== T repeated DecoderRNN.forward calls, carrying
    the hidden state) inside ONE pallas_call.

    token_ids: (T,) int32
    hidden:    (1, 1, H) float32
    returns:   (log_probs (T, output_size) f32, hidden_new (1, 1, H) f32)
    """
    T = int(token_ids.shape[0])
    H = params["w_gates"].shape[1]
    O_PAD = params["w_out"].shape[1]
    h0 = hidden.reshape(1, H).astype(jnp.float32)

    grid_spec = pltpu.PrefetchScalarGridSpec(
        num_scalar_prefetch=1,          # token ids -> SMEM, drive the gather
        grid=(T,),
        in_specs=[
            # embedding row gather: block row index = token id
            pl.BlockSpec((1, 1, H), lambda t, tok: (tok[t], 0, 0)),
            # weights / biases: constant block index -> DMA'd once, resident
            pl.BlockSpec((2, H, 3 * H), lambda t, tok: (0, 0, 0)),
            pl.BlockSpec((1, 4 * H + O_PAD), lambda t, tok: (0, 0)),
            pl.BlockSpec((H, O_PAD), lambda t, tok: (0, 0)),
            pl.BlockSpec((1, H), lambda t, tok: (0, 0)),
        ],
        out_specs=(
            # per-step log-probs (lane-dense, OUT_PAD = 128)
            pl.BlockSpec((1, 1, O_PAD), lambda t, tok: (t, 0, 0)),
            # same block every step -> carried-hidden accumulator
            pl.BlockSpec((1, H), lambda t, tok: (0, 0)),
        ),
    )

    logp_pad, h_out = pl.pallas_call(
        _decoder_kernel,
        grid_spec=grid_spec,
        out_shape=(
            jax.ShapeDtypeStruct((T, 1, O_PAD), jnp.float32),
            jax.ShapeDtypeStruct((1, H), jnp.float32),
        ),
        compiler_params=pltpu.CompilerParams(
            dimension_semantics=("arbitrary",)),  # time steps carry state
    )(token_ids.astype(jnp.int32),
      params["embedding"], params["w_gates"], params["biases"],
      params["w_out"], h0)

    logp = logp_pad.reshape(T, O_PAD)[:, :output_size]
    return logp, h_out.reshape(1, 1, H)


# ----------------------------------------------------------------------------
# Parameter construction (PyTorch-layout raw params + kernel-layout packing)
# ----------------------------------------------------------------------------
def init_raw_params(key, hidden_size=HIDDEN_SIZE, output_size=OUTPUT_SIZE):
    """Deterministic synthetic parameters in PyTorch layout."""
    H, O = hidden_size, output_size
    ks = jax.random.split(key, 7)
    s = 1.0 / jnp.sqrt(H)
    return {
        "embedding": jax.random.normal(ks[0], (O, H), jnp.float32),        # nn.Embedding
        "w_ih": jax.random.uniform(ks[1], (3 * H, H), jnp.float32, -s, s), # GRU weight_ih_l0
        "w_hh": jax.random.uniform(ks[2], (3 * H, H), jnp.float32, -s, s), # GRU weight_hh_l0
        "b_ih": jax.random.uniform(ks[3], (3 * H,), jnp.float32, -s, s),
        "b_hh": jax.random.uniform(ks[4], (3 * H,), jnp.float32, -s, s),
        "w_out": jax.random.uniform(ks[5], (O, H), jnp.float32, -s, s),    # nn.Linear
        "b_out": jax.random.uniform(ks[6], (O,), jnp.float32, -s, s),
    }


def pack_params(raw, out_pad=OUT_PAD):
    """Repack PyTorch-layout params into the kernel layout:
    bf16 fused gate weights (2,H,3H), one f32 bias vector (1, 4H+out_pad)
    with r/z biases pre-summed and the padded output bias set to -1e30,
    bf16 zero-padded output projection (H, out_pad), bf16 embedding (O,1,H)."""
    H = raw["w_ih"].shape[1]
    O = raw["w_out"].shape[0]

    # (3H,H) row blocks [r;z;n] -> transposed & fused (H,3H); stack ih/hh.
    w_gates = jnp.stack([raw["w_ih"].T, raw["w_hh"].T], axis=0).astype(jnp.bfloat16)

    b_ih, b_hh = raw["b_ih"], raw["b_hh"]
    b_out_pad = jnp.concatenate(
        [raw["b_out"], jnp.full((out_pad - O,), -1e30, jnp.float32)])
    biases = jnp.concatenate([
        b_ih[0:H] + b_hh[0:H],           # r gate (combined)
        b_ih[H:2 * H] + b_hh[H:2 * H],   # z gate (combined)
        b_ih[2 * H:3 * H],               # b_in
        b_hh[2 * H:3 * H],               # b_hn (kept separate: r * (Wh·h + b_hn))
        b_out_pad,
    ]).reshape(1, 4 * H + out_pad)

    w_out = jnp.zeros((H, out_pad), jnp.float32).at[:, :O].set(raw["w_out"].T)

    return {
        "embedding": raw["embedding"].astype(jnp.bfloat16).reshape(O, 1, H),
        "w_gates": w_gates,
        "biases": biases,
        "w_out": w_out.astype(jnp.bfloat16),
    }


# ----------------------------------------------------------------------------
# Pure-JAX reference (mirrors PyTorch forward, with the same bf16 matmul casts)
# ----------------------------------------------------------------------------
def _reference_step(tok, h, raw):
    H = raw["w_ih"].shape[1]
    x = jnp.maximum(raw["embedding"][tok].reshape(1, H), 0.0)
    gi = jnp.dot(x.astype(jnp.bfloat16), raw["w_ih"].astype(jnp.bfloat16).T,
                 preferred_element_type=jnp.float32) + raw["b_ih"][None]
    gh = jnp.dot(h.astype(jnp.bfloat16), raw["w_hh"].astype(jnp.bfloat16).T,
                 preferred_element_type=jnp.float32) + raw["b_hh"][None]
    r = jax.nn.sigmoid(gi[:, 0:H] + gh[:, 0:H])
    z = jax.nn.sigmoid(gi[:, H:2 * H] + gh[:, H:2 * H])
    n = jnp.tanh(gi[:, 2 * H:] + r * gh[:, 2 * H:])
    h_new = (1.0 - z) * n + z * h
    logits = jnp.dot(h_new.astype(jnp.bfloat16), raw["w_out"].astype(jnp.bfloat16).T,
                     preferred_element_type=jnp.float32) + raw["b_out"][None]
    return jax.nn.log_softmax(logits, axis=1), h_new


if __name__ == "__main__":
    key = jax.random.PRNGKey(0)
    k_params, k_tok = jax.random.split(key)

    raw = init_raw_params(k_params)
    params = pack_params(raw)

    token_ids = jax.random.randint(k_tok, (SEQ_LEN,), 0, OUTPUT_SIZE, dtype=jnp.int32)
    hidden0 = jnp.zeros((1, 1, HIDDEN_SIZE), jnp.float32)   # initHidden()

    logp, h_new = decoder_rnn_forward(token_ids, hidden0, params)
    jax.block_until_ready((logp, h_new))

    # Sanity check: repeated single-step PyTorch-style forward, carrying hidden.
    h = hidden0.reshape(1, HIDDEN_SIZE)
    ref_logps = []
    for t in range(SEQ_LEN):
        lp, h = _reference_step(token_ids[t], h, raw)
        ref_logps.append(lp)
    logp_ref = jnp.concatenate(ref_logps, axis=0)
    h_ref = h.reshape(1, 1, HIDDEN_SIZE)

    assert logp.shape == (SEQ_LEN, OUTPUT_SIZE)
    assert h_new.shape == (1, 1, HIDDEN_SIZE)
    assert jnp.allclose(logp, logp_ref, atol=5e-3, rtol=0), "log-prob mismatch"
    assert jnp.allclose(h_new, h_ref, atol=5e-3, rtol=0), "hidden mismatch"

    print("KERNEL_OK")
</pallas_src>

<mosaic_0001>
module attributes {stable_mosaic.version = 11 : i64} {
  func.func @_decoder_kernel(%arg0: i32, %arg1: memref<8xi32, #tpu.memory_space<smem>>, %arg2: memref<1x1x128xbf16, #tpu.memory_space<vmem>>, %arg3: memref<2x128x384xbf16, #tpu.memory_space<vmem>>, %arg4: memref<1x640xf32, #tpu.memory_space<vmem>>, %arg5: memref<128x128xbf16, #tpu.memory_space<vmem>>, %arg6: memref<1x128xf32, #tpu.memory_space<vmem>>, %arg7: memref<1x1x128xf32, #tpu.memory_space<vmem>>, %arg8: memref<1x128xf32, #tpu.memory_space<vmem>>) attributes {dimension_semantics = [#tpu.dimension_semantics<arbitrary>], iteration_bounds = array<i64: 8>, scalar_prefetch = 1 : i64, scratch_operands = 0 : i64, tpu.core_type = #tpu.core_type<tc>, window_params = [{transform_indices = @transform_0, window_bounds = array<i64: 1, 1, 128>}, {pipeline_mode = #tpu.pipeline_mode<synchronous>, transform_indices = @transform_1, window_bounds = array<i64: 2, 128, 384>}, {pipeline_mode = #tpu.pipeline_mode<synchronous>, transform_indices = @transform_2, window_bounds = array<i64: 1, 640>}, {pipeline_mode = #tpu.pipeline_mode<synchronous>, transform_indices = @transform_3, window_bounds = array<i64: 128, 128>}, {pipeline_mode = #tpu.pipeline_mode<synchronous>, transform_indices = @transform_4, window_bounds = array<i64: 1, 128>}, {transform_indices = @transform_5, window_bounds = array<i64: 1, 1, 128>}, {pipeline_mode = #tpu.pipeline_mode<synchronous>, transform_indices = @transform_6, window_bounds = array<i64: 1, 128>}]} {
    %c0_i32 = arith.constant 0 : i32
    %0 = arith.cmpi eq, %arg0, %c0_i32 : i32
    %1 = arith.extui %0 : i1 to i32
    %c0_i32_0 = arith.constant 0 : i32
    %2 = arith.cmpi ne, %1, %c0_i32_0 : i32
    scf.if %2 {
      %c0_27 = arith.constant 0 : index
      %c0_28 = arith.constant 0 : index
      %69 = vector.load %arg6[%c0_27, %c0_28] : memref<1x128xf32, #tpu.memory_space<vmem>>, vector<1x128xf32>
      %c0_29 = arith.constant 0 : index
      %c0_30 = arith.constant 0 : index
      %70 = vector.load %arg8[%c0_29, %c0_30] : memref<1x128xf32, #tpu.memory_space<vmem>>, vector<1x128xf32>
      tpu.vector_store %arg8[%c0_29, %c0_30], %69 {strides = array<i32>} : memref<1x128xf32, #tpu.memory_space<vmem>>, vector<1x128xf32>,
    } else {
    }
    %c0 = arith.constant 0 : index
    %c0_1 = arith.constant 0 : index
    %c0_2 = arith.constant 0 : index
    %3 = vector.load %arg2[%c0, %c0_1, %c0_2] : memref<1x1x128xbf16, #tpu.memory_space<vmem>>, vector<1x1x128xbf16>
    %4 = vector.shape_cast %3 : vector<1x1x128xbf16> to vector<1x128xbf16>
    %cst = arith.constant 0.000000e+00 : bf16
    %5 = vector.broadcast %cst : bf16 to vector<1x128xbf16>
    %6 = arith.maximumf %4, %5 : vector<1x128xbf16>
    %c0_3 = arith.constant 0 : index
    %c0_4 = arith.constant 0 : index
    %7 = vector.load %arg8[%c0_3, %c0_4] : memref<1x128xf32, #tpu.memory_space<vmem>>, vector<1x128xf32>
    %c0_5 = arith.constant 0 : index
    %c0_6 = arith.constant 0 : index
    %c0_7 = arith.constant 0 : index
    %8 = vector.load %arg3[%c0_5, %c0_6, %c0_7] : memref<2x128x384xbf16, #tpu.memory_space<vmem>>, vector<1x128x384xbf16>
    %9 = vector.shape_cast %8 : vector<1x128x384xbf16> to vector<128x384xbf16>
    %cst_8 = arith.constant dense<0.000000e+00> : vector<1x384xf32>
    %10 = tpu.matmul %6, %9, %cst_8 {dimension_numbers = #tpu.dot_dimension_numbers<[1], [0], [0], [1], [0, 0, 1, 1], [], []>} : vector<1x128xbf16>, vector<128x384xbf16>, vector<1x384xf32> -> vector<1x384xf32>
    %11 = arith.truncf %7 : vector<1x128xf32> to vector<1x128xbf16>
    %c1 = arith.constant 1 : index
    %c0_9 = arith.constant 0 : index
    %c0_10 = arith.constant 0 : index
    %12 = vector.load %arg3[%c1, %c0_9, %c0_10] : memref<2x128x384xbf16, #tpu.memory_space<vmem>>, vector<1x128x384xbf16>
    %13 = vector.shape_cast %12 : vector<1x128x384xbf16> to vector<128x384xbf16>
    %cst_11 = arith.constant dense<0.000000e+00> : vector<1x384xf32>
    %14 = tpu.matmul %11, %13, %cst_11 {dimension_numbers = #tpu.dot_dimension_numbers<[1], [0], [0], [1], [0, 0, 1, 1], [], []>} : vector<1x128xbf16>, vector<128x384xbf16>, vector<1x384xf32> -> vector<1x384xf32>
    %c0_12 = arith.constant 0 : index
    %c0_13 = arith.constant 0 : index
    %15 = vector.load %arg4[%c0_12, %c0_13] : memref<1x640xf32, #tpu.memory_space<vmem>>, vector<1x640xf32>
    %16 = vector.extract_strided_slice %15 {offsets = [0, 0], sizes = [1, 128], strides = [1, 1]} : vector<1x640xf32> to vector<1x128xf32>
    %17 = vector.extract_strided_slice %15 {offsets = [0, 128], sizes = [1, 128], strides = [1, 1]} : vector<1x640xf32> to vector<1x128xf32>
    %18 = vector.extract_strided_slice %15 {offsets = [0, 256], sizes = [1, 128], strides = [1, 1]} : vector<1x640xf32> to vector<1x128xf32>
    %19 = vector.extract_strided_slice %15 {offsets = [0, 384], sizes = [1, 128], strides = [1, 1]} : vector<1x640xf32> to vector<1x128xf32>
    %20 = vector.extract_strided_slice %15 {offsets = [0, 512], sizes = [1, 128], strides = [1, 1]} : vector<1x640xf32> to vector<1x128xf32>
    %21 = vector.extract_strided_slice %10 {offsets = [0, 0], sizes = [1, 128], strides = [1, 1]} : vector<1x384xf32> to vector<1x128xf32>
    %22 = vector.extract_strided_slice %14 {offsets = [0, 0], sizes = [1, 128], strides = [1, 1]} : vector<1x384xf32> to vector<1x128xf32>
    %23 = arith.addf %21, %22 : vector<1x128xf32>
    %24 = arith.addf %23, %16 : vector<1x128xf32>
    %25 = arith.negf %24 : vector<1x128xf32>
    %26 = math.exp %25 : vector<1x128xf32>
    %cst_14 = arith.constant 1.000000e+00 : f32
    %27 = vector.broadcast %cst_14 : f32 to vector<1x128xf32>
    %28 = arith.addf %27, %26 : vector<1x128xf32>
    %29 = arith.divf %27, %28 : vector<1x128xf32>
    %30 = vector.extract_strided_slice %10 {offsets = [0, 128], sizes = [1, 128], strides = [1, 1]} : vector<1x384xf32> to vector<1x128xf32>
    %31 = vector.extract_strided_slice %14 {offsets = [0, 128], sizes = [1, 128], strides = [1, 1]} : vector<1x384xf32> to vector<1x128xf32>
    %32 = arith.addf %30, %31 : vector<1x128xf32>
    %33 = arith.addf %32, %17 : vector<1x128xf32>
    %34 = arith.negf %33 : vector<1x128xf32>
    %35 = math.exp %34 : vector<1x128xf32>
    %cst_15 = arith.constant 1.000000e+00 : f32
    %36 = vector.broadcast %cst_15 : f32 to vector<1x128xf32>
    %37 = arith.addf %36, %35 : vector<1x128xf32>
    %38 = arith.divf %36, %37 : vector<1x128xf32>
    %39 = vector.extract_strided_slice %10 {offsets = [0, 256], sizes = [1, 128], strides = [1, 1]} : vector<1x384xf32> to vector<1x128xf32>
    %40 = arith.addf %39, %18 : vector<1x128xf32>
    %41 = vector.extract_strided_slice %14 {offsets = [0, 256], sizes = [1, 128], strides = [1, 1]} : vector<1x384xf32> to vector<1x128xf32>
    %42 = arith.addf %41, %19 : vector<1x128xf32>
    %43 = arith.mulf %29, %42 : vector<1x128xf32>
    %44 = arith.addf %40, %43 : vector<1x128xf32>
    %45 = math.tanh %44 : vector<1x128xf32>
    %cst_16 = arith.constant 1.000000e+00 : f32
    %46 = vector.broadcast %cst_16 : f32 to vector<1x128xf32>
    %47 = arith.subf %46, %38 : vector<1x128xf32>
    %48 = arith.mulf %47, %45 : vector<1x128xf32>
    %49 = arith.mulf %38, %7 : vector<1x128xf32>
    %50 = arith.addf %48, %49 : vector<1x128xf32>
    %51 = arith.truncf %50 : vector<1x128xf32> to vector<1x128xbf16>
    %c0_17 = arith.constant 0 : index
    %c0_18 = arith.constant 0 : index
    %52 = vector.load %arg5[%c0_17, %c0_18] : memref<128x128xbf16, #tpu.memory_space<vmem>>, vector<128x128xbf16>
    %cst_19 = arith.constant dense<0.000000e+00> : vector<1x128xf32>
    %53 = tpu.matmul %51, %52, %cst_19 {dimension_numbers = #tpu.dot_dimension_numbers<[1], [0], [0], [1], [0, 0, 1, 1], [], []>} : vector<1x128xbf16>, vector<128x128xbf16>, vector<1x128xf32> -> vector<1x128xf32>
    %54 = arith.addf %53, %20 : vector<1x128xf32>
    %cst_20 = arith.constant dense<0xFF800000> : vector<1xf32>
    %55 = vector.multi_reduction <maximumf>, %54, %cst_20 [1] : vector<1x128xf32> to vector<1xf32>
    %56 = vector.shape_cast %55 : vector<1xf32> to vector<1x1xf32>
    %57 = vector.broadcast %56 : vector<1x1xf32> to vector<1x128xf32>
    %58 = arith.subf %54, %57 : vector<1x128xf32>
    %59 = math.exp %58 : vector<1x128xf32>
    %cst_21 = arith.constant dense<0.000000e+00> : vector<1xf32>
    %60 = vector.multi_reduction <add>, %59, %cst_21 [1] : vector<1x128xf32> to vector<1xf32>
    %61 = vector.shape_cast %60 : vector<1xf32> to vector<1x1xf32>
    %62 = math.log %61 : vector<1x1xf32>
    %63 = vector.broadcast %62 : vector<1x1xf32> to vector<1x128xf32>
    %64 = arith.subf %58, %63 : vector<1x128xf32>
    %c0_22 = arith.constant 0 : index
    %c0_23 = arith.constant 0 : index
    %c0_24 = arith.constant 0 : index
    %65 = vector.load %arg7[%c0_22, %c0_23, %c0_24] : memref<1x1x128xf32, #tpu.memory_space<vmem>>, vector<1x1x128xf32>
    %66 = vector.shape_cast %65 : vector<1x1x128xf32> to vector<1x128xf32>
    %67 = vector.shape_cast %64 : vector<1x128xf32> to vector<1x1x128xf32>
    tpu.vector_store %arg7[%c0_22, %c0_23, %c0_24], %67 {strides = array<i32>} : memref<1x1x128xf32, #tpu.memory_space<vmem>>, vector<1x1x128xf32>,
    %c0_25 = arith.constant 0 : index
    %c0_26 = arith.constant 0 : index
    %68 = vector.load %arg8[%c0_25, %c0_26] : memref<1x128xf32, #tpu.memory_space<vmem>>, vector<1x128xf32>
    tpu.vector_store %arg8[%c0_25, %c0_26], %50 {strides = array<i32>} : memref<1x128xf32, #tpu.memory_space<vmem>>, vector<1x128xf32>,
    return
  }
  func.func @transform_0(%arg0: i32, %arg1: memref<8xi32, #tpu.memory_space<smem>>) -> (i32, i32, i32) {
    %0 = arith.index_cast %arg0 : i32 to index
    %1 = memref.load %arg1[%0] : memref<8xi32, #tpu.memory_space<smem>>
    %c0_i32 = arith.constant 0 : i32
    %c0_i32_0 = arith.constant 0 : i32
    %c0_i32_1 = arith.constant 0 : i32
    return %1, %c0_i32, %c0_i32_0 : i32, i32, i32
  }
  func.func @transform_1(%arg0: i32, %arg1: memref<8xi32, #tpu.memory_space<smem>>) -> (i32, i32, i32) {
    %c0_i32 = arith.constant 0 : i32
    %c0_i32_0 = arith.constant 0 : i32
    %c0_i32_1 = arith.constant 0 : i32
    %c0_i32_2 = arith.constant 0 : i32
    return %c0_i32, %c0_i32_0, %c0_i32_1 : i32, i32, i32
  }
  func.func @transform_2(%arg0: i32, %arg1: memref<8xi32, #tpu.memory_space<smem>>) -> (i32, i32) {
    %c0_i32 = arith.constant 0 : i32
    %c0_i32_0 = arith.constant 0 : i32
    %c0_i32_1 = arith.constant 0 : i32
    return %c0_i32, %c0_i32_0 : i32, i32
  }
  func.func @transform_3(%arg0: i32, %arg1: memref<8xi32, #tpu.memory_space<smem>>) -> (i32, i32) {
    %c0_i32 = arith.constant 0 : i32
    %c0_i32_0 = arith.constant 0 : i32
    %c0_i32_1 = arith.constant 0 : i32
    return %c0_i32, %c0_i32_0 : i32, i32
  }
  func.func @transform_4(%arg0: i32, %arg1: memref<8xi32, #tpu.memory_space<smem>>) -> (i32, i32) {
    %c0_i32 = arith.constant 0 : i32
    %c0_i32_0 = arith.constant 0 : i32
    %c0_i32_1 = arith.constant 0 : i32
    return %c0_i32, %c0_i32_0 : i32, i32
  }
  func.func @transform_5(%arg0: i32, %arg1: memref<8xi32, #tpu.memory_space<smem>>) -> (i32, i32, i32) {
    %c0_i32 = arith.constant 0 : i32
    %c0_i32_0 = arith.constant 0 : i32
    %c0_i32_1 = arith.constant 0 : i32
    return %arg0, %c0_i32, %c0_i32_0 : i32, i32, i32
  }
  func.func @transform_6(%arg0: i32, %arg1: memref<8xi32, #tpu.memory_space<smem>>) -> (i32, i32) {
    %c0_i32 = arith.constant 0 : i32
    %c0_i32_0 = arith.constant 0 : i32
    %c0_i32_1 = arith.constant 0 : i32
    return %c0_i32, %c0_i32_0 : i32, i32
  }
}

</mosaic_0001>

<bundles_post_ra>
// kernel: tpu_custom_call.1
= control target key start
LH: loop header
LB: loop body
LE: loop exit
PB: predicated region body
PF: predicated region fallthrough
CT: control target
= control target key end

     0   :  { %s1810_s0 = inlined_call_operand.vmem [shape: s32[8], index: 0, kind: input, shape index: {}]   ;;  %s1811_s1 = inlined_call_operand.vmem [shape: bf16[40,1,128], index: 1, kind: input, shape index: {}]   ;;  %s1812_s2 = inlined_call_operand.hbm [shape: bf16[2,128,384], index: 2, kind: input, shape index: {}]   ;;  %s1813_s3 = inlined_call_operand.hbm [shape: f32[1,640], index: 3, kind: input, shape index: {}]   ;;  %s1814_s4 = inlined_call_operand.vmem [shape: bf16[128,128], index: 4, kind: input, shape index: {}]   ;;  %s1815_s5 = inlined_call_operand.vmem [shape: f32[1,128], index: 5, kind: input, shape index: {}]   ;;  %s1816_s6 = inlined_call_operand.hbm [shape: f32[8,1,128], index: 6, kind: output, shape index: {0}]   ;;  %s1817_s7 = inlined_call_operand.hbm [shape: f32[1,128], index: 7, kind: output, shape index: {1}]  }
   0x1   :  { %s13_s26 = sshll.u32 %s1810_s0, 4  ;;  %s14_s26 = int_to_ptr.vmem [resolvable:$true] %s13_s26 }
   0x2   :  { %s1372_s27 = scalar_lea.vmem %s14_s26, 16  ;;  %p1377_p1 = scmp.lt.s32.totalorder %s14_s26, %s14_s26 }
   0x3   :  { %p1373_p0 = scmp.ne.s32.totalorder %s14_s26, %s1372_s27  ;;  %p1378_p2 = scmp.lt.s32.totalorder %s1372_s27, %s1372_s27 }
   0x5   :  { %p1379_p3 = por %p1378_p2, %p1377_p1 }
   0x7   :  { %p1380_p4 = pnand %p1379_p3, %p1373_p0 }
   0x9   :  { %1383 = shalt.err (!%p1380_p4)  }
   0xa   :  { %s1536_s28 = smov [#allocation3]  }
   0xb   :  { %16 = dma.vmem_to_smem %s14_s26, 16, %s1536_s28, [#allocation2] }
   0xc   :  { %1502 = dma.done.wait [#allocation2], 16 }
   0xd   :  { %1503 = vsyncadd [#allocation2], 4294967280 }
   0xe   :  { %18 = sfence }
   0xf   :  { %19 = vsyncpa [#allocation5], 0 }
  0x10   :  { %20 = vsyncpa [#allocation8], 0 }
  0x11   :  { %21 = vsyncpa [#allocation6], 0 }
  0x12   :  { %23 = vsyncpa [#allocation6 + $0x1], 0 }
  0x13   :  { %24 = vsyncpa [#allocation11], 0  ;;  %s1589_s29 = smov 0   ;;  %s1591_s0 = smov 0  }
  0x14   :  { %s1593_s30 = smov 0   ;;  %s1595_s8 = smov 0  }
  0x15 LB: > { %s1610_s9 = sadd.s32 4294967295, %s1534_s8   ;;  %s1054_s10 = sadd.s32 4294967294, %s1534_s8   ;;  %s1534_s8 = sphi %s1595_s8, %s1836_s8   ;;  %s1530_s30 = sphi %s1593_s30, %s1835_s30   ;;  %s1526_s0 = sphi %s1591_s0, %s1834_s0   ;;  %s1522_s29 = sphi %s1589_s29, %s1833_s29  }
  0x16   : > { %s1614_s11 = sadd.s32 1, %s1534_s8   ;;  %s149_s12 = sadd.s32 1, %s1530_s30 }
  0x17   : > { %s146_s13 = ssub.s32 %s1534_s8, %s1614_s11  ;;  %p159_p5 = scmp.ne.s32.totalorder %s1530_s30, %s1526_s0 }
  0x18   : > { %p147_p6 = scmp.eq.s32.totalorder %s146_s13, 0  ;;  %p1818_p7 = scmp.eq.s32.totalorder %s1610_s9, 7 }
  0x19   : > { %p165_p8 = scmp.ne.s32.totalorder %s1526_s0, %s1522_s29  ;;  %p166_p9 = scmp.eq.s32.totalorder %s1054_s10, 7 }
  0x1a   : > { %s1625_s14 = scalar_select %p147_p6, %s1530_s30, %s149_s12  }
  0x1b   : > { %p1629_p10 = por %p1818_p7, %p159_p5  ;;  %p1633_p11 = por %p166_p9, %p165_p8 }
  0x1c   : > { %p1055_p12 = scmp.ge.s32.totalorder %s1534_s8, 1  ;;  %p194_p13 = scmp.lt.s32.totalorder %s1534_s8, 9 }
  0x1d   : > { %p1819_p1 = scmp.eq.s32.totalorder %s1610_s9, 0  ;;  %s1537_s18 = smov [#allocation4]  }
  0x1e   : > { %p1641_p2 = pnand %p1055_p12, %p194_p13  ;;  %s206_s19 = sshll.u32 %s1537_s18, 4  ;;  %s207_s19 = int_to_ptr.vmem [resolvable:$true] %s206_s19 }
  0x1f   : > { %s1538_s21 = smov [#allocation7]   ;;  %s1395_s23 = scalar_lea.vmem %s207_s19, 6144 }
  0x20   : > { %p1227_p3 = pneg %p1641_p2  ;;  %s220_s22 = sshll.u32 %s1538_s21, 4  ;;  %s221_s22 = int_to_ptr.vmem [resolvable:$true] %s220_s22 }
  0x21   : > { %p1396_p6 = scmp.ne.s32.totalorder %s207_s19, %s1395_s23  ;;  %p1403_p12 = scmp.lt.s32.totalorder %s207_s19, %s207_s19 }
  0x22   : > { %p1649_p4 = pnand %p1819_p1, %p1227_p3  ;;  %p1404_p13 = scmp.lt.s32.totalorder %s1395_s23, %s1395_s23 }
  0x24   : > { %p1386_p5 = pneg %p1649_p4  ;;  %p1405_p7 = por %p1404_p13, %p1403_p12 }
  0x26   : > { %p1398_p8 = pnand %p1396_p6, %p1386_p5 }
  0x28   : > { %p1399_p9 = pneg %p1398_p8 }
  0x2a   : > { %p1406_p3 = pnand %p1405_p7, %p1399_p9 }
  0x2c   : > { %1409 = shalt.err (!%p1406_p3)
}
  0x2d   : > { %s1539_s24 = smov 192   ;;  %s1540_s25 = smov 12  }
  0x2e   : > { %1230 = dma.hbm_to_vmem [thread:$0]  (!%p1649_p4), %s1812_s2, 6144, %s207_s19, [#allocation5], %s1539_s24, %s1539_s24, %s1540_s25  }
  0x2f   : > { %s1421_s28 = scalar_lea.vmem %s221_s22, 80  ;;  %s1428_s10 = scalar_lea.vmem %s221_s22, 96 }
  0x30   : > { %p1422_p0 = scmp.ne.s32.totalorder %s221_s22, %s1421_s28  ;;  %p1429_p1 = scmp.lt.s32.totalorder %s221_s22, %s221_s22 }
  0x31   : > { %p1430_p12 = scmp.lt.s32.totalorder %s1428_s10, %s1421_s28 }
  0x32   : > { %p1424_p6 = pnand %p1422_p0, %p1386_p5 }
  0x33   : > { %p1431_p7 = por %p1430_p12, %p1429_p1 }
  0x34   : > { %p1425_p8 = pneg %p1424_p6 }
  0x36   : > { %p1432_p9 = pnand %p1431_p7, %p1425_p8 }
  0x38   : > { %1435 = shalt.err (!%p1432_p9)
}
  0x39   : > { %1233 = dma.hbm_to_vmem [thread:$0]  (!%p1649_p4), %s1813_s3, 80, %s221_s22, [#allocation8]  }
  0x3a   : > { %247 = sbr.rel (%p1641_p2) target bundleno = 926 (0x39e), region = 40  ;;  %p1824_p13 = scmp.eq.s32.totalorder (!%p1641_p2), %s1610_s9, 0 }
  0x3f   : > { %1505 = dma.done.wait (%p1824_p13), [#allocation5], 6144   ;;  %p1825_p0 = pmov %p1824_p13 }
  0x41   : > { %1507 = vsyncadd (%p1825_p0), [#allocation5], 4294961152  ;;  %p1826_p5 = pmov %p1825_p0 }
  0x42   : > { %p1827_p1 = pmov %p1825_p0 }
  0x43   : > { %1509 = dma.done.wait (%p1826_p5), [#allocation8], 80  }
  0x44   : > { %1511 = vsyncadd (%p1827_p1), [#allocation8], 4294967216  ;;  %s275_s18 = sand.u32 1, %s1526_s0   ;;  %s279_s19 = sld [smem:[#allocation3 + %s1610_s9]] }
  0x45   : > { %s1691_s22 = scalar_lea.vmem [#allocation9], %s275_s18  ;;  %p1828_p2 = scmp.ne.s32.totalorder %s1610_s9, 0 }
  0x49   : > { %288 = sbr.rel (%p1828_p2) target bundleno = 80 (0x50), region = 52 }
  0x4a   : > { %p280_p4 = scmp.lt.s32.totalorder %s279_s19, 39 }
  0x4c   : > { %s1838_s19 = smov (!%p280_p4, %s279_s19), 39 }
  0x4d   : > { %s282_s21 = scalar_lea.vmem %s1811_s1, %s1838_s19 }
  0x4e   : > { %v289_v0 = vld [vmem:[%s1815_s5] sm:$0x1] }
  0x4f   : > { %290 = vst [vmem:[#allocation10] sm:$0x1] %v289_v0 }
  0x50 PF: > { %v1286_v1 = vld [vmem:[#allocation4 + $0xac] ss:$12 sps:$4 sm:$0xff]   ;;  %v1288_v2 = vld [vmem:[#allocation4 + $0xa8] ss:$12 sps:$4 sm:$0xff]   ;;  %v1541_v3 = vmov 0.0   ;;  %v1542_v4 = vmov 0  }
  0x51   : > { %1153 = vmatprep.subr.bf16.mxu1 %v1541_v3  ;;  %486 = vmatprep.mubr.bf16.mxu0 %v1542_v4  ;;  %v1289_v5 = vld [vmem:[#allocation4 + $0x94] ss:$12 sps:$4 sm:$0xff]   ;;  %vm1543_vm0 = vmmov 0   ;;  %v1291_v6 = vld [vmem:[#allocation4 + $0x90] ss:$12 sps:$4 sm:$0xff]   ;;  %v1352_v57 = vld [vmem:[%s1814_s4 + $0x28] sm:$0xff]  }
  0x52   : > { %454 = vmatprep.subr.bf16.mxu0 %v1286_v1  ;;  %1169 = vmatprep.mubr.msk.bf16.mxu1 %vm1543_vm0, %v1541_v3  ;;  %v1292_v7 = vld [vmem:[#allocation4 + $0x7c] ss:$12 sps:$4 sm:$0xff]   ;;  %v1294_v8 = vld [vmem:[#allocation4 + $0x78] ss:$12 sps:$4 sm:$0xff]   ;;  %v1297_v10 = vld [vmem:[#allocation4 + $0x60] ss:$12 sps:$4 sm:$0xff]  }
  0x53   : > { %455 = vmatpush1.bf16.msra.mxu0 %v1288_v2  ;;  %v1295_v9 = vld [vmem:[#allocation4 + $0x64] ss:$12 sps:$4 sm:$0xff]   ;;  %v1298_v12 = vld [vmem:[#allocation4 + $0x4c] ss:$12 sps:$4 sm:$0xff]   ;;  %v1300_v14 = vld [vmem:[#allocation4 + $0x48] ss:$12 sps:$4 sm:$0xff]  }
  0x54   : > { %456 = vmatprep.subr.bf16.mxu0 %v1289_v5  ;;  %v1310_v11 = vld [vmem:[#allocation4 + $0xb0] ss:$12 sps:$4 sm:$0xff]   ;;  %v1314_v13 = vld [vmem:[#allocation4 + $0x98] ss:$12 sps:$4 sm:$0xff]   ;;  %v1301_v15 = vld [vmem:[#allocation4 + $0x34] ss:$12 sps:$4 sm:$0xff]  }
  0x55   : > { %1154 = vmatpush3.bf16.msra.mxu1 %v1310_v11  ;;  %v1318_v16 = vld [vmem:[#allocation4 + $0x80] ss:$12 sps:$4 sm:$0xff]   ;;  %v1303_v17 = vld [vmem:[#allocation4 + $0x30] ss:$12 sps:$4 sm:$0xff]   ;;  %v1322_v19 = vld [vmem:[#allocation4 + $0x68] ss:$12 sps:$4 sm:$0xff]  }
  0x56   : > { %1155 = vmatprep.subr.bf16.mxu1 %v1541_v3  ;;  %v1304_v18 = vld [vmem:[#allocation4 + $0x1c] ss:$12 sps:$4 sm:$0xff]   ;;  %v1306_v20 = vld [vmem:[#allocation4 + $0x18] ss:$12 sps:$4 sm:$0xff]   ;;  %v1309_v23 = vld [vmem:[#allocation4] ss:$12 sps:$4 sm:$0xff]  }
  0x57   : > { %457 = vmatpush1.bf16.msra.mxu0 %v1291_v6  ;;  %v1307_v21 = vld [vmem:[#allocation4 + $0x4] ss:$12 sps:$4 sm:$0xff]   ;;  %v291_v24 = vld [vmem:[%s282_s21] sm:$0x1]  ;;  %v1313_v25 = vld [vmem:[#allocation4 + $0x16c] ss:$12 sps:$4 sm:$0xff]  }
  0x58   : > { %458 = vmatprep.subr.bf16.mxu0 %v1292_v7  ;;  %v1326_v22 = vld [vmem:[#allocation4 + $0x50] ss:$12 sps:$4 sm:$0xff]   ;;  %v1330_v26 = vld [vmem:[#allocation4 + $0x38] ss:$12 sps:$4 sm:$0xff]   ;;  %v292_v27 = vmax.bf16 %v1542_v4, %v291_v24  ;;  %v1311_v28 = vld [vmem:[#allocation4 + $0x168] ss:$12 sps:$4 sm:$0xff]  }
  0x59   : > { %1156 = vmatpush3.bf16.msra.mxu1 %v1314_v13  ;;  %v1317_v29 = vld [vmem:[#allocation4 + $0x154] ss:$12 sps:$4 sm:$0xff]   ;;  %v1315_v31 = vld [vmem:[#allocation4 + $0x150] ss:$12 sps:$4 sm:$0xff]   ;;  %v1319_v33 = vld [vmem:[#allocation4 + $0x138] ss:$12 sps:$4 sm:$0xff]  }
  0x5a   : > { %1157 = vmatprep.subr.bf16.mxu1 %v1541_v3  ;;  %v1334_v30 = vld [vmem:[#allocation4 + $0x20] ss:$12 sps:$4 sm:$0xff]   ;;  %v1321_v32 = vld [vmem:[#allocation4 + $0x13c] ss:$12 sps:$4 sm:$0xff]   ;;  %v1325_v35 = vld [vmem:[#allocation4 + $0x124] ss:$12 sps:$4 sm:$0xff]  }
  0x5b   : > { %459 = vmatpush1.bf16.msra.mxu0 %v1294_v8  ;;  %v1338_v34 = vld [vmem:[#allocation4 + $0x8] ss:$12 sps:$4 sm:$0xff]   ;;  %v1342_v36 = vld [vmem:[#allocation4 + $0x170] ss:$12 sps:$4 sm:$0xff]   ;;  %v1323_v37 = vld [vmem:[#allocation4 + $0x120] ss:$12 sps:$4 sm:$0xff]   ;;  %v789_v8 = vlaneseq }
  0x5c   : > { %460 = vmatprep.subr.bf16.mxu0 %v1295_v9  ;;  %v1329_v38 = vld [vmem:[#allocation4 + $0x10c] ss:$12 sps:$4 sm:$0xff]   ;;  %v1327_v40 = vld [vmem:[#allocation4 + $0x108] ss:$12 sps:$4 sm:$0xff]   ;;  %v1331_v43 = vld [vmem:[#allocation4 + $0xf0] ss:$12 sps:$4 sm:$0xff]  }
  0x5d   : > { %1158 = vmatpush3.bf16.msra.mxu1 %v1318_v16  ;;  %v1343_v39 = vld [vmem:[#allocation4 + $0x158] ss:$12 sps:$4 sm:$0xff]   ;;  %v1333_v41 = vld [vmem:[#allocation4 + $0xf4] ss:$12 sps:$4 sm:$0xff]   ;;  %v1337_v44 = vld [vmem:[#allocation4 + $0xdc] ss:$12 sps:$4 sm:$0xff]  }
  0x5e   : > { %1159 = vmatprep.subr.bf16.mxu1 %v1541_v3  ;;  %v1344_v42 = vld [vmem:[#allocation4 + $0x140] ss:$12 sps:$4 sm:$0xff]   ;;  %v1345_v45 = vld [vmem:[#allocation4 + $0x128] ss:$12 sps:$4 sm:$0xff]   ;;  %v1335_v46 = vld [vmem:[#allocation4 + $0xd8] ss:$12 sps:$4 sm:$0xff]  }
  0x5f   : > { %461 = vmatpush1.bf16.msra.mxu0 %v1297_v10  ;;  %v1341_v47 = vld [vmem:[#allocation4 + $0xc4] ss:$12 sps:$4 sm:$0xff]   ;;  %v1339_v49 = vld [vmem:[#allocation4 + $0xc0] ss:$12 sps:$4 sm:$0xff]   ;;  %v1720_v50 = vld [vmem:[#allocation10] sm:$0x1] }
  0x60   : > { %462 = vmatprep.subr.bf16.mxu0 %v1298_v12  ;;  %v1346_v48 = vld [vmem:[#allocation4 + $0x110] ss:$12 sps:$4 sm:$0xff]   ;;  %v1347_v51 = vld [vmem:[#allocation4 + $0xf8] ss:$12 sps:$4 sm:$0xff]   ;;  %v535_v52 = vpack.c.bf16 %v1720_v50, %v1720_v50  ;;  %v1348_v53 = vld [vmem:[#allocation4 + $0xe0] ss:$12 sps:$4 sm:$0xff]  }
  0x61   : > { %1160 = vmatpush3.bf16.msra.mxu1 %v1322_v19  ;;  %v1349_v54 = vld [vmem:[#allocation4 + $0xc8] ss:$12 sps:$4 sm:$0xff]   ;;  %v1350_v55 = vld [vmem:[%s1814_s4 + $0x38] sm:$0xff]   ;;  %v1353_v58 = vld [vmem:[%s1814_s4 + $0x20] sm:$0xff]   ;;  %v790_v9 = vshrl.u32 %v789_v8, 7  ;;  %vm930_vm1 = vcmask 1040384  }
  0x62   : > { %1161 = vmatprep.subr.bf16.mxu1 %v1541_v3  ;;  %v1351_v56 = vld [vmem:[%s1814_s4 + $0x30] sm:$0xff]   ;;  %v1354_v59 = vld [vmem:[%s1814_s4 + $0x18] sm:$0xff]   ;;  %v1356_v61 = vld [vmem:[%s1814_s4 + $0x8] sm:$0xff]   ;;  %s1544_s12 = smov [#allocation10]   ;;  %p1829_p6 = scmp.eq.s32.totalorder %s1610_s9, 7 }
  0x63   : > { %463 = vmatpush1.bf16.msra.mxu0 %v1300_v14  ;;  %v1355_v60 = vld [vmem:[%s1814_s4 + $0x10] sm:$0xff]   ;;  %v1357_v62 = vld [vmem:[%s1814_s4] sm:$0xff]   ;;  %v791_v13 = vsub.s32 1, %v790_v9  ;;  %s969_s13 = sshll.u32 %s1544_s12, 4  ;;  %s970_s13 = int_to_ptr.vmem [resolvable:$true] %s969_s13 }
  0x64   : > { %464 = vmatprep.subr.bf16.mxu0 %v1301_v15  ;;  %v778_v10 = vld [vmem:[#allocation7] sm:$0x1f]  ;;  %s1436_s19 = scalar_lea.vmem %s970_s13, 16  ;;  %s1442_s17 = scalar_lea.vmem %s970_s13, 32 }
  0x65   : > { %1162 = vmatpush3.bf16.msra.mxu1 %v1326_v22  ;;  %p1437_p3 = scmp.ne.s32.totalorder %s970_s13, %s1436_s19  ;;  %p1443_p7 = scmp.lt.s32.totalorder %s970_s13, %s970_s13 }
  0x66   : > { %1163 = vmatprep.subr.bf16.mxu1 %v1541_v3  ;;  %p1444_p9 = scmp.lt.s32.totalorder %s1442_s17, %s1436_s19 }
  0x67   : > { %465 = vmatpush1.bf16.msra.mxu0 %v1303_v17  ;;  %p1438_p8 = pnand %p1437_p3, %p1829_p6 }
  0x68   : > { %466 = vmatprep.subr.bf16.mxu0 %v1304_v18  ;;  %v792_v18 = vrot.slane %v778_v10, %v791_v13  ;;  %p1445_p13 = por %p1444_p9, %p1443_p7 }
  0x69   : > { %1164 = vmatpush3.bf16.msra.mxu1 %v1330_v26  ;;  %p1439_p12 = pneg %p1438_p8 }
  0x6a   : > { %1165 = vmatprep.subr.bf16.mxu1 %v1541_v3 }
  0x6b   : > { %467 = vmatpush1.bf16.msra.mxu0 %v1306_v20  ;;  %p1446_p0 = pnand %p1445_p13, %p1439_p12 }
  0x6c   : > { %468 = vmatprep.subr.bf16.mxu0 %v1307_v21 }
  0x6d   : > { %1166 = vmatpush3.bf16.msra.mxu1 %v1334_v30 }
  0x6e   : > { %1167 = vmatprep.subr.bf16.mxu1 %v1541_v3 }
  0x6f   : > { %469 = vmatpush1.bf16.msra.mxu0 %v1309_v23 }
  0x70   : > { %697 = vmatprep.subr.bf16.mxu0 %v1313_v25 }
  0x71   : > { %1168 = vmatpush3.bf16.msra.mxu1 %v1338_v34 }
  0x72   : > { %487 = vmatmul.mubr.bf16.vlgmr.msra.gmra.mxu0 %v292_v27  ;;  %1173 = vmatprep.subr.bf16.mxu1 %v1541_v3 }
  0x73   : > { %698 = vmatpush1.bf16.msra.mxu0 %v1311_v28  ;;  %729 = vmatprep.mubr.bf16.mxu0 %v1542_v4  ;;  %v809_v28 = vsub.s32 3, %v790_v9 }
  0x74   : > { %699 = vmatprep.subr.bf16.mxu0 %v1317_v29  ;;  %1170 = vmatmul.mubr.bf16.vlgmr.msra.gmra.mxu1 %v292_v27  ;;  %v803_v29 = vsub.s32 2, %v790_v9 }
  0x75   : > { %1174 = vmatpush3.bf16.msra.mxu1 %v1342_v36  ;;  %1189 = vmatprep.mubr.msk.bf16.mxu1 %vm1543_vm0, %v1541_v3  ;;  %v810_v30 = vrot.slane %v778_v10, %v809_v28 }
  0x76   : > { %1175 = vmatprep.subr.bf16.mxu1 %v1541_v3 }
  0x77   : > { %700 = vmatpush1.bf16.msra.mxu0 %v1315_v31 }
  0x78   : > { %701 = vmatprep.subr.bf16.mxu0 %v1321_v32  ;;  %v804_v32 = vrot.slane %v778_v10, %v803_v29 }
  0x79   : > { %1176 = vmatpush3.bf16.msra.mxu1 %v1343_v39 }
  0x7a   : > { %1177 = vmatprep.subr.bf16.mxu1 %v1541_v3 }
  0x7b   : > { %702 = vmatpush1.bf16.msra.mxu0 %v1319_v33 }
  0x7c   : > { %703 = vmatprep.subr.bf16.mxu0 %v1325_v35 }
  0x7d   : > { %1178 = vmatpush3.bf16.msra.mxu1 %v1344_v42 }
  0x7e   : > { %1179 = vmatprep.subr.bf16.mxu1 %v1541_v3 }
  0x7f   : > { %704 = vmatpush1.bf16.msra.mxu0 %v1323_v37 }
  0x80   : > { %705 = vmatprep.subr.bf16.mxu0 %v1329_v38 }
  0x81   : > { %1180 = vmatpush3.bf16.msra.mxu1 %v1345_v45 }
  0x82   : > { %1181 = vmatprep.subr.bf16.mxu1 %v1541_v3 }
  0x83   : > { %706 = vmatpush1.bf16.msra.mxu0 %v1327_v40 }
  0x84   : > { %707 = vmatprep.subr.bf16.mxu0 %v1333_v41 }
  0x85   : > { %1182 = vmatpush3.bf16.msra.mxu1 %v1346_v48 }
  0x86   : > { %1183 = vmatprep.subr.bf16.mxu1 %v1541_v3 }
  0x87   : > { %708 = vmatpush1.bf16.msra.mxu0 %v1331_v43 }
  0x88   : > { %709 = vmatprep.subr.bf16.mxu0 %v1337_v44 }
  0x89   : > { %1184 = vmatpush3.bf16.msra.mxu1 %v1347_v51 }
  0x8a   : > { %1185 = vmatprep.subr.bf16.mxu1 %v1541_v3 }
  0x8b   : > { %710 = vmatpush1.bf16.msra.mxu0 %v1335_v46  ;;  %v887_v46 = vsub.s32 4, %v790_v9 }
  0x8c   : > { %711 = vmatprep.subr.bf16.mxu0 %v1341_v47 }
  0x8d   : > { %1186 = vmatpush3.bf16.msra.mxu1 %v1348_v53  ;;  %v888_v47 = vrot.slane %v778_v10, %v887_v46 }
  0x8e   : > { %1187 = vmatprep.subr.bf16.mxu1 %v1541_v3 }
  0x8f   : > { %712 = vmatpush1.bf16.msra.mxu0 %v1339_v49 }
  0x90   : > { %1193 = vmatprep.subr.bf16.mxu0 %v1541_v3 }
  0x91   : > { %1188 = vmatpush3.bf16.msra.mxu1 %v1349_v54 }
  0x92   : > { %730 = vmatmul.mubr.bf16.vlgmr.msra.gmra.mxu0 %v535_v52 }
  0x93   : > { %1209 = vmatprep.mubr.msk.bf16.mxu0 %vm1543_vm0, %v1541_v3  ;;  %1194 = vmatpush3.bf16.msra.mxu0 %v1350_v55 }
  0x94   : > { %1190 = vmatmul.mubr.bf16.vlgmr.msra.gmra.mxu1 %v535_v52  ;;  %1195 = vmatprep.subr.bf16.mxu0 %v1541_v3 }
  0x97   : > { %1196 = vmatpush3.bf16.msra.mxu0 %v1351_v56 }
  0x98   : > { %1197 = vmatprep.subr.bf16.mxu0 %v1541_v3 }
  0x9b   : > { %1198 = vmatpush3.bf16.msra.mxu0 %v1352_v57 }
  0x9c   : > { %1199 = vmatprep.subr.bf16.mxu0 %v1541_v3 }
  0x9f   : > { %1200 = vmatpush3.bf16.msra.mxu0 %v1353_v58 }
  0xa0   : > { %1201 = vmatprep.subr.bf16.mxu0 %v1541_v3 }
  0xa3   : > { %1202 = vmatpush3.bf16.msra.mxu0 %v1354_v59 }
  0xa4   : > { %1203 = vmatprep.subr.bf16.mxu0 %v1541_v3 }
  0xa7   : > { %1204 = vmatpush3.bf16.msra.mxu0 %v1355_v60 }
  0xa8   : > { %1205 = vmatprep.subr.bf16.mxu0 %v1541_v3 }
  0xab   : > { %1206 = vmatpush3.bf16.msra.mxu0 %v1356_v61 }
  0xac   : > { %1207 = vmatprep.subr.bf16.mxu0 %v1541_v3 }
  0xaf   : > { %1208 = vmatpush3.bf16.msra.mxu0 %v1357_v62 }
 0x132   : > { %v488_v63 = vpop.f32.mrf.mxu0 }
 0x134   : > { %v490_v0 = vpop.f32.mrf.mxu0  ;;  %v529_v4 = vpop.f32.mrf.mxu1 }
 0x135   : > { %v806_v36 = vadd.f32 %v804_v32, %v529_v4 }
 0x136   : > { %v492_v1 = vpop.f32.mrf.mxu0  ;;  %v1171_v5 = vpop.f32.mrf.mxu1 }
 0x138   : > { %v493_v2 = vpop.f32.mrf.mxu0  ;;  %v532_v6 = vpop.f32.mrf.mxu1 }
 0x13a   : > { %v1172_v7 = vpop.f32.mrf.mxu1 }
 0x152   : > { %v731_v11 = vpop.f32.mrf.mxu0 }
 0x153   : > { %v779_v12 = vadd.f32 %v731_v11, %v488_v63 }
 0x154   : > { %v733_v14 = vpop.f32.mrf.mxu0  ;;  %v772_v21 = vpop.f32.mrf.mxu1 }
 0x155   : > { %v780_v15 = vadd.f32 %v779_v12, %v778_v10  ;;  %v787_v3 = vadd.f32 %v733_v14, %v490_v0  ;;  %v812_v34 = vadd.f32 %v810_v30, %v772_v21 }
 0x156   : > { %v735_v16 = vpop.f32.mrf.mxu0  ;;  %v1191_v22 = vpop.f32.mrf.mxu1 }
 0x157   : > { %v1111_v17 = vmul.f32 -1.442695, %v780_v15  ;;  %v794_v20 = vadd.f32 %v792_v18, %v787_v3 }
 0x158   : > { %v736_v19 = vpop.f32.mrf.mxu0  ;;  %v775_v24 = vpop.f32.mrf.mxu1 }
 0x159   : > { %1358 = vpow2.f32 %v1111_v17  ;;  %v1112_v23 = vmul.f32 -1.442695, %v794_v20 }
 0x15a   : > { %v1192_v25 = vpop.f32.mrf.mxu1 }
 0x15b   : > { %1360 = vpow2.f32 %v1112_v23 }
 0x166   : > { %v1359_v26 = vpop.eup %1358 }
 0x167   : > { %v784_v27 = vadd.f32 1.0, %v1359_v26 }
 0x168   : > { %v1361_v31 = vpop.eup %1360 }
 0x169   : > { %1362 = vrcp.f32 %v784_v27  ;;  %v798_v33 = vadd.f32 1.0, %v1361_v31 }
 0x16b   : > { %1364 = vrcp.f32 %v798_v33 }
 0x176   : > { %v1363_v35 = vpop.eup %1362 }
 0x177   : > { %v813_v37 = vmul.f32 %v1363_v35, %v812_v34 }
 0x178   : > { %v1365_v39 = vpop.eup %1364 }
 0x179   : > { %v814_v38 = vadd.f32 %v813_v37, %v806_v36  ;;  %v816_v40 = vsub.f32 1.0, %v1365_v39  ;;  %v818_v43 = vmul.f32 %v1365_v39, %v1720_v50 }
 0x17b   : > { %1366 = vtanh.f32 %v814_v38 }
 0x188   : > { %v1367_v41 = vpop.eup %1366 }
 0x189   : > { %v817_v42 = vmul.f32 %v1367_v41, %v816_v40 }
 0x18b   : > { %v819_v44 = vadd.f32 %v818_v43, %v817_v42 }
 0x18d   : > { %v820_v45 = vpack.c.bf16 %v819_v44, %v819_v44  ;;  %944 = vst [vmem:[#allocation10] sm:$0x1] %v819_v44 }
 0x18f   : > { %1210 = vmatmul.mubr.bf16.vlgmr.msra.gmra.mxu0 %v820_v45 }
 0x24f   : > { %v924_v48 = vpop.f32.mrf.mxu0 }
 0x250   : > { %v925_v49 = vadd.f32 %v924_v48, %v888_v47 }
 0x251   : > { %v1211_v51 = vpop.f32.mrf.mxu0 }
 0x252   : > { %v931_v52 = vsel %vm930_vm1, %v925_v49, -inf }
 0x253   : > { %932 = vmax.xlane.f32.xlu0 %v931_v52  ;;  %v927_v53 = vpop.f32.mrf.mxu0 }
 0x255   : > { %v1212_v54 = vpop.f32.mrf.mxu0 }
 0x2dc   : > { %v933_v55 = vpop.xlane.xlu0 %932 }
 0x2dd   : > { %v934_v56 = vsub.f32 %v925_v49, %v933_v55 }
 0x2df   : > { %v935_v57 = vmul.f32 1.442695, %v934_v56 }
 0x2e1   : > { %1368 = vpow2.f32 %v935_v57 }
 0x2ee   : > { %v1369_v50 = vpop.eup %1368 }
 0x2ef   : > { %v937_v58 = vsel %vm930_vm1, %v1369_v50, 0.0 }
 0x2f0   : > { %938 = vadd.xlane.f32.xlu0 %v937_v58 }
 0x2f1   : > { %1449 = shalt.err (!%p1446_p0)
}
 0x2f2   : > { %p1830_p5 = pmov %p1829_p6  ;;  %s1121_s23 = sshll.u32 %s1610_s9, 4 }
 0x2f3   : > { %s958_s24 = sshll.u32 %s1691_s22, 4  ;;  %s956_s27 = scalar_lea.hbm %s1816_s6, %s1121_s23  ;;  %s959_s24 = int_to_ptr.vmem [resolvable:$true] %s958_s24 }
 0x2f4   : > { %1223 = dma.vmem_to_hbm [thread:$0]  (%p1830_p5), %s970_s13, 16, %s1817_s7, [#allocation11]  }
 0x2f5   : > { %s946_s28 = scalar_lea.sflag [#allocation6], %s275_s18  ;;  %s1460_s10 = scalar_lea.vmem %s959_s24, 16 }
 0x2f6   : > { %p1461_p1 = scmp.ne.s32.totalorder %s959_s24, %s1460_s10  ;;  %s1545_s12 = smov [#allocation9]  }
 0x2f7   : > { %s1464_s13 = sshll.u32 %s1545_s12, 4  ;;  %s1465_s13 = int_to_ptr.vmem [resolvable:$false] %s1464_s13 }
 0x2f8   : > { %p1462_p4 = pnand %p1461_p1, %p1629_p10  ;;  %s1466_s19 = scalar_lea.vmem %s1465_s13, 32 }
 0x2f9   : > { %p1467_p3 = scmp.lt.s32.totalorder %s959_s24, %s1465_s13  ;;  %p1468_p6 = scmp.lt.s32.totalorder %s1466_s19, %s1460_s10 }
 0x2fa   : > { %p1463_p2 = pneg %p1462_p4 }
 0x2fb   : > { %p1469_p8 = por %p1468_p6, %p1467_p3 }
 0x2fd   : > { %p1470_p12 = pnand %p1469_p8, %p1463_p2 }
 0x379   : > { %v939_v59 = vpop.xlane.xlu0 %938 }
 0x37a   : > { %1370 = vlog2.f32 %v939_v59 }
 0x387   : > { %v1371_v60 = vpop.eup %1370 }
 0x388   : > { %v941_v61 = vmul.f32 0.6931472, %v1371_v60 }
 0x38a   : > { %v942_v62 = vsub.f32 %v934_v56, %v941_v61 }
 0x38c   : > { %943 = vst [vmem:[%s1691_s22] sm:$0x1] %v942_v62 }
 0x38d   : > { %1473 = shalt.err (!%p1470_p12)
}
 0x38e   : > { %s1474_s17 = scalar_lea.hbm %s956_s27, 16  ;;  %s1478_s20 = scalar_lea.hbm %s1816_s6, 128 }
 0x38f   : > { %p1475_p7 = scmp.ne.s32.totalorder %s956_s27, %s1474_s17  ;;  %p1479_p0 = scmp.lt.s32.totalorder %s956_s27, %s1816_s6 }
 0x390   : > { %p1480_p5 = scmp.lt.s32.totalorder %s1478_s20, %s1474_s17 }
 0x391   : > { %p1476_p9 = pnand %p1475_p7, %p1629_p10 }
 0x392   : > { %p1481_p1 = por %p1480_p5, %p1479_p0 }
 0x393   : > { %p1477_p13 = pneg %p1476_p9 }
 0x395   : > { %p1482_p4 = pnand %p1481_p1, %p1477_p13 }
 0x397   : > { %1485 = shalt.err (!%p1482_p4)
}
 0x398   : > { %1221 = dma.vmem_to_hbm [thread:$0]  (%p1629_p10), %s959_s24, 16, %s956_s27, %s946_s28  }
 0x399   : > { %p1831_p2 = scmp.eq.s32.totalorder %s1610_s9, 7 }
 0x39b   : > { %1513 = dma.done.wait (%p1831_p2), [#allocation11], 16   ;;  %p1832_p3 = pmov %p1831_p2 }
 0x39d   : > { %1515 = vsyncadd (%p1832_p3), [#allocation11], 4294967280 }
 0x39e PF: > { %p1244_p6 = scmp.ge.s32.totalorder %s1534_s8, 2  ;;  %s985_s25 = sand.u32 1, %s1522_s29  }
 0x39f   : > { %s986_s26 = scalar_lea.sflag [#allocation6], %s985_s25 }
 0x3a0   : > { %p1235_p8 = pnand %p1244_p6, %p1633_p11 }
 0x3a2   : > { %p1236_p12 = pneg %p1235_p8 }
 0x3a4   : > { %1517 = dma.done.wait (%p1236_p12), %s986_s26, 16  }
 0x3a5   : > { %1519 = vsyncadd (%p1236_p12), %s986_s26, 4294967280  ;;  %p27_p10 = scmp.ge.s32.totalorder %s1614_s11, 10   ;;  %s1833_s29 = smov %s1526_s0 }
 0x3a6   : > { %s1834_s0 = smov %s1530_s30  ;;  %s1835_s30 = smov %s1625_s14 }
 0x3a7   : > { %s1836_s8 = smov %s1614_s11  ;;  %29 = sbr.rel (!%p27_p10) target bundleno = 21 (0x15), region = 97 }
 0x3ac   :  { %990 = vsyncpa [#allocation5], 1 }
 0x3ad   :  { %992 = vsyncpa [#allocation5 + $0x1], 1 }
 0x3ae   :  { %993 = vsyncpa [#allocation8], 1 }
 0x3af   :  { %994 = vsyncpa [#allocation6], 1 }
 0x3b0   :  { %996 = vsyncpa [#allocation6 + $0x1], 1 }
 0x3b1   :  { %997 = vsyncpa [#allocation11], 1 }

</bundles_post_ra>
